<compile_context>
chip_gen: v7x
topology: tpu7x:2x2x1
jax: 0.10.0
libtpu: 0.0.40
codegen_flags: <defaults>
</compile_context>

<pallas_src>
import jax
import jax.numpy as jnp
from jax import lax
from jax.experimental import pallas as pl
from jax.experimental.pallas import tpu as pltpu


def _round_up(a, m):
    return (a + m - 1) // m * m


def global_attention_kernel(x_ref, batch_ref, w_ref, b_ref,
                            out_ref, gate_ref, wx_ref,
                            m_ref, l_ref):
    p = pl.program_id(0)      # pass: 0 = segment max/sum, 1 = gate/wx/out
    t = pl.program_id(1)      # node tile

    tile_n = x_ref.shape[0]
    h_pad = out_ref.shape[1]
    b_pad = m_ref.shape[1]

    # Segment one-hot for this node tile (VPU work, shared by both passes).
    batch_tile = batch_ref[...]                               # [tile_n, 1] (-1 = pad row)
    seg_ids = lax.broadcasted_iota(jnp.int32, (tile_n, b_pad), 1)
    is_member = batch_tile == seg_ids                          # [tile_n, b_pad]
    one_hot = is_member.astype(jnp.float32)

    @pl.when(jnp.logical_and(p == 0, t == 0))
    def _init_stats():
        m_ref[...] = jnp.full((1, b_pad), -1e30, jnp.float32)
        l_ref[...] = jnp.zeros((1, b_pad), jnp.float32)

    @pl.when(p == 0)
    def _pass0():
        # Gate-only projection: only the replicated-gate lane block of the
        # fused weight is multiplied here (static, 128-aligned slice).
        logit_blk = jnp.dot(
            x_ref[...], w_ref[:, pl.ds(h_pad, b_pad)],
            preferred_element_type=jnp.float32) + b_ref[:, pl.ds(h_pad, b_pad)]
        masked = jnp.where(is_member, logit_blk, jnp.float32(-1e30))
        # Online per-graph softmax statistics (numerically stable).
        tile_max = jnp.max(masked, axis=0, keepdims=True)      # [1, b_pad]
        m_old = m_ref[...]
        l_old = l_ref[...]
        m_new = jnp.maximum(m_old, tile_max)
        p_mat = jnp.exp(masked - m_new) * one_hot              # [tile_n, b_pad]
        l_ref[...] = l_old * jnp.exp(m_old - m_new) + jnp.sum(
            p_mat, axis=0, keepdims=True)
        m_ref[...] = m_new

    @pl.when(jnp.logical_and(p == 1, t == 0))
    def _init_out():
        out_ref[...] = jnp.zeros_like(out_ref)

    @pl.when(p == 1)
    def _pass1():
        # Full fused projection: nn(x) columns + replicated gate logit columns.
        y = jnp.dot(x_ref[...], w_ref[...],
                    preferred_element_type=jnp.float32) + b_ref[...]
        h = y[:, :h_pad]                                        # [tile_n, h_pad]
        logit_blk = y[:, h_pad:]                                # [tile_n, b_pad]
        masked = jnp.where(is_member, logit_blk, jnp.float32(-1e30))

        inv_l = 1.0 / (l_ref[...] + jnp.float32(1e-16))         # [1, b_pad]
        gate_mat = jnp.exp(masked - m_ref[...]) * one_hot * inv_l  # [tile_n, b_pad]
        gate_col = jnp.sum(gate_mat, axis=1, keepdims=True)     # [tile_n, 1] (pad rows -> 0)
        wx = gate_col * h                                       # [tile_n, h_pad]
        gate_ref[...] = gate_col
        wx_ref[...] = wx
        # scatter_add over segments: contract node axis directly (no .T relayout)
        out_ref[...] += lax.dot_general(
            gate_mat, h,
            dimension_numbers=(((0,), (0,)), ((), ())),
            preferred_element_type=jnp.float32)


def global_attention(x, batch, wg, bg, wn, bn, num_graphs, *, tile_n=512):
    """Pallas forward of my_GlobalAttention.
    x: [N, F] f32, batch: [N] int32 (sorted), wg: [F, 1], bg: [1],
    wn: [F, H], bn: [H].  Returns (out [B, H], gate [N, 1], weighted_x [N, H])."""
    n, f = x.shape
    h_dim = wn.shape[1]
    lane = 128

    tile_n = min(tile_n, _round_up(n, 8))
    n_pad = _round_up(n, tile_n)
    f_pad = _round_up(f, lane)
    h_pad = _round_up(h_dim, lane)
    b_pad = _round_up(num_graphs, lane)
    c = h_pad + b_pad
    num_tiles = n_pad // tile_n

    # Padded / fused operands (bf16 activations & weights, f32 accumulate).
    x_p = jnp.zeros((n_pad, f_pad), jnp.bfloat16).at[:n, :f].set(
        x.astype(jnp.bfloat16))
    batch_p = jnp.full((n_pad, 1), -1, jnp.int32).at[:n, 0].set(
        batch.astype(jnp.int32))
    w_fused = jnp.zeros((f_pad, c), jnp.float32)
    w_fused = w_fused.at[:f, :h_dim].set(wn)
    w_fused = w_fused.at[:f, h_pad:].set(jnp.broadcast_to(wg, (f, b_pad)))
    w_fused = w_fused.astype(jnp.bfloat16)
    b_fused = jnp.zeros((1, c), jnp.float32)
    b_fused = b_fused.at[0, :h_dim].set(bn)
    b_fused = b_fused.at[0, h_pad:].set(bg[0])

    out_shapes = (
        jax.ShapeDtypeStruct((b_pad, h_pad), jnp.float32),   # out (resident acc)
        jax.ShapeDtypeStruct((n_pad, 1), jnp.float32),       # gate
        jax.ShapeDtypeStruct((n_pad, h_pad), jnp.float32),   # weighted_x
    )

    grid_spec = pltpu.PrefetchScalarGridSpec(
        num_scalar_prefetch=0,
        grid=(2, num_tiles),                                  # (pass, node tile)
        in_specs=[
            pl.BlockSpec((tile_n, f_pad), lambda p, t: (t, 0)),
            pl.BlockSpec((tile_n, 1), lambda p, t: (t, 0)),
            pl.BlockSpec((f_pad, c), lambda p, t: (0, 0)),    # weights resident
            pl.BlockSpec((1, c), lambda p, t: (0, 0)),        # biases resident
        ],
        out_specs=(
            pl.BlockSpec((b_pad, h_pad), lambda p, t: (0, 0)),
            # p * t keeps the block index frozen at 0 during pass 0 so the
            # never-written gate/wx buffers are not flushed to HBM until pass 1
            # produces real data.
            pl.BlockSpec((tile_n, 1), lambda p, t: (p * t, 0)),
            pl.BlockSpec((tile_n, h_pad), lambda p, t: (p * t, 0)),
        ),
        scratch_shapes=[
            pltpu.VMEM((1, b_pad), jnp.float32),   # running per-graph max
            pltpu.VMEM((1, b_pad), jnp.float32),   # running per-graph sum
        ],
    )

    out_p, gate_p, wx_p = pl.pallas_call(
        global_attention_kernel,
        out_shape=out_shapes,
        grid_spec=grid_spec,
        compiler_params=pltpu.CompilerParams(
            dimension_semantics=("arbitrary", "arbitrary"),
            vmem_limit_bytes=32 * 1024 * 1024,
        ),
    )(x_p, batch_p, w_fused, b_fused)

    return (out_p[:num_graphs, :h_dim], gate_p[:n], wx_p[:n, :h_dim])


def _reference(x, batch, wg, bg, wn, bn, num_graphs):
    # Mirrors the kernel's bf16-input / f32-accumulate projections.
    xb = x.astype(jnp.bfloat16)
    logit = jnp.dot(xb, wg.astype(jnp.bfloat16),
                    preferred_element_type=jnp.float32) + bg.reshape(1, 1)
    h = jnp.dot(xb, wn.astype(jnp.bfloat16),
                preferred_element_type=jnp.float32) + bn.reshape(1, -1)
    seg_max = jax.ops.segment_max(logit[:, 0], batch, num_segments=num_graphs)
    p = jnp.exp(logit[:, 0] - seg_max[batch])
    seg_sum = jax.ops.segment_sum(p, batch, num_segments=num_graphs)
    gate = (p / (seg_sum[batch] + 1e-16)).reshape(-1, 1)
    wx = gate * h
    out = jax.ops.segment_sum(wx, batch, num_segments=num_graphs)
    return out, gate, wx


if __name__ == "__main__":
    key = jax.random.PRNGKey(0)
    N, F, H = 8, 32, 16                     # nodes, in-features, nn hidden
    batch = jnp.array([0, 0, 0, 1, 1, 2, 2, 2], dtype=jnp.int32)
    num_graphs = int(batch[-1]) + 1         # size = batch[-1].item() + 1

    kx, kwg, kwn, kbn = jax.random.split(key, 4)
    x = jax.random.normal(kx, (N, F), dtype=jnp.float32)
    # gate_nn = Linear(F, 1); nn = Linear(F, H) — deterministic synthetic init
    wg = jax.random.normal(kwg, (F, 1), dtype=jnp.float32) * 0.1
    bg = jnp.zeros((1,), dtype=jnp.float32)
    wn = jax.random.normal(kwn, (F, H), dtype=jnp.float32) * 0.1
    bn = jax.random.normal(kbn, (H,), dtype=jnp.float32) * 0.1

    out, gate, wx = global_attention(x, batch, wg, bg, wn, bn, num_graphs)
    jax.block_until_ready((out, gate, wx))

    ref_out, ref_gate, ref_wx = _reference(x, batch, wg, bg, wn, bn, num_graphs)
    assert out.shape == (num_graphs, H) and gate.shape == (N, 1) and wx.shape == (N, H)
    assert jnp.allclose(out, ref_out, atol=1e-3, rtol=1e-3)
    assert jnp.allclose(gate, ref_gate, atol=1e-3, rtol=1e-3)
    assert jnp.allclose(wx, ref_wx, atol=1e-3, rtol=1e-3)
    print("KERNEL_OK")
</pallas_src>

<mosaic_0001>
module attributes {stable_mosaic.version = 11 : i64} {
  func.func @global_attention_kernel(%arg0: i32, %arg1: i32, %arg2: memref<8x128xbf16, #tpu.memory_space<vmem>>, %arg3: memref<8x1xi32, #tpu.memory_space<vmem>>, %arg4: memref<128x256xbf16, #tpu.memory_space<vmem>>, %arg5: memref<1x256xf32, #tpu.memory_space<vmem>>, %arg6: memref<128x128xf32, #tpu.memory_space<vmem>>, %arg7: memref<8x1xf32, #tpu.memory_space<vmem>>, %arg8: memref<8x128xf32, #tpu.memory_space<vmem>>, %arg9: memref<1x128xf32, #tpu.memory_space<vmem>>, %arg10: memref<1x128xf32, #tpu.memory_space<vmem>>) attributes {dimension_semantics = [#tpu.dimension_semantics<arbitrary>, #tpu.dimension_semantics<arbitrary>], iteration_bounds = array<i64: 2, 1>, scalar_prefetch = 0 : i64, scratch_operands = 2 : i64, tpu.core_type = #tpu.core_type<tc>, window_params = [{transform_indices = @transform_0, window_bounds = array<i64: 8, 128>}, {transform_indices = @transform_1, window_bounds = array<i64: 8, 1>}, {pipeline_mode = #tpu.pipeline_mode<synchronous>, transform_indices = @transform_2, window_bounds = array<i64: 128, 256>}, {pipeline_mode = #tpu.pipeline_mode<synchronous>, transform_indices = @transform_3, window_bounds = array<i64: 1, 256>}, {pipeline_mode = #tpu.pipeline_mode<synchronous>, transform_indices = @transform_4, window_bounds = array<i64: 128, 128>}, {transform_indices = @transform_5, window_bounds = array<i64: 8, 1>}, {transform_indices = @transform_6, window_bounds = array<i64: 8, 128>}]} {
    %c0 = arith.constant 0 : index
    %c0_0 = arith.constant 0 : index
    %0 = vector.load %arg3[%c0, %c0_0] : memref<8x1xi32, #tpu.memory_space<vmem>>, vector<8x1xi32>
    %1 = tpu.iota {dimensions = array<i32: 1>} : vector<8x128xi32>
    %2 = vector.broadcast %0 : vector<8x1xi32> to vector<8x128xi32>
    %3 = arith.cmpi eq, %2, %1 : vector<8x128xi32>
    %4 = arith.extui %3 : vector<8x128xi1> to vector<8x128xi32>
    %5 = arith.sitofp %4 : vector<8x128xi32> to vector<8x128xf32>
    %c0_i32 = arith.constant 0 : i32
    %6 = arith.cmpi eq, %arg0, %c0_i32 : i32
    %c0_i32_1 = arith.constant 0 : i32
    %7 = arith.cmpi eq, %arg1, %c0_i32_1 : i32
    %8 = arith.andi %6, %7 : i1
    %9 = arith.extui %8 : i1 to i32
    %c0_i32_2 = arith.constant 0 : i32
    %10 = arith.cmpi ne, %9, %c0_i32_2 : i32
    scf.if %10 {
      %cst = arith.constant -1.000000e+30 : f32
      %22 = vector.broadcast %cst : f32 to vector<1x128xf32>
      %c0_9 = arith.constant 0 : index
      %c0_10 = arith.constant 0 : index
      %23 = vector.load %arg9[%c0_9, %c0_10] : memref<1x128xf32, #tpu.memory_space<vmem>>, vector<1x128xf32>
      tpu.vector_store %arg9[%c0_9, %c0_10], %22 {strides = array<i32>} : memref<1x128xf32, #tpu.memory_space<vmem>>, vector<1x128xf32>,
      %cst_11 = arith.constant 0.000000e+00 : f32
      %24 = vector.broadcast %cst_11 : f32 to vector<1x128xf32>
      %c0_12 = arith.constant 0 : index
      %c0_13 = arith.constant 0 : index
      %25 = vector.load %arg10[%c0_12, %c0_13] : memref<1x128xf32, #tpu.memory_space<vmem>>, vector<1x128xf32>
      tpu.vector_store %arg10[%c0_12, %c0_13], %24 {strides = array<i32>} : memref<1x128xf32, #tpu.memory_space<vmem>>, vector<1x128xf32>,
    } else {
    }
    %c0_i32_3 = arith.constant 0 : i32
    %11 = arith.cmpi eq, %arg0, %c0_i32_3 : i32
    %12 = arith.extui %11 : i1 to i32
    %c0_i32_4 = arith.constant 0 : i32
    %13 = arith.cmpi ne, %12, %c0_i32_4 : i32
    scf.if %13 {
      %c0_9 = arith.constant 0 : index
      %c0_10 = arith.constant 0 : index
      %22 = vector.load %arg2[%c0_9, %c0_10] : memref<8x128xbf16, #tpu.memory_space<vmem>>, vector<8x128xbf16>
      %c0_11 = arith.constant 0 : index
      %c128 = arith.constant 128 : index
      %23 = vector.load %arg4[%c0_11, %c128] : memref<128x256xbf16, #tpu.memory_space<vmem>>, vector<128x128xbf16>
      %cst = arith.constant dense<0.000000e+00> : vector<8x128xf32>
      %24 = tpu.matmul %22, %23, %cst {dimension_numbers = #tpu.dot_dimension_numbers<[1], [0], [0], [1], [0, 0, 1, 1], [], []>} : vector<8x128xbf16>, vector<128x128xbf16>, vector<8x128xf32> -> vector<8x128xf32>
      %c0_12 = arith.constant 0 : index
      %c128_13 = arith.constant 128 : index
      %25 = vector.load %arg5[%c0_12, %c128_13] : memref<1x256xf32, #tpu.memory_space<vmem>>, vector<1x128xf32>
      %26 = vector.broadcast %25 : vector<1x128xf32> to vector<8x128xf32>
      %27 = arith.addf %24, %26 : vector<8x128xf32>
      %cst_14 = arith.constant -1.000000e+30 : f32
      %28 = vector.broadcast %cst_14 : f32 to vector<8x128xf32>
      %29 = arith.select %3, %27, %28 : vector<8x128xi1>, vector<8x128xf32>
      %cst_15 = arith.constant dense<0xFF800000> : vector<128xf32>
      %30 = vector.multi_reduction <maximumf>, %29, %cst_15 [0] : vector<8x128xf32> to vector<128xf32>
      %31 = vector.shape_cast %30 : vector<128xf32> to vector<1x128xf32>
      %c0_16 = arith.constant 0 : index
      %c0_17 = arith.constant 0 : index
      %32 = vector.load %arg9[%c0_16, %c0_17] : memref<1x128xf32, #tpu.memory_space<vmem>>, vector<1x128xf32>
      %c0_18 = arith.constant 0 : index
      %c0_19 = arith.constant 0 : index
      %33 = vector.load %arg10[%c0_18, %c0_19] : memref<1x128xf32, #tpu.memory_space<vmem>>, vector<1x128xf32>
      %34 = arith.maximumf %32, %31 : vector<1x128xf32>
      %35 = vector.broadcast %34 : vector<1x128xf32> to vector<8x128xf32>
      %36 = arith.subf %29, %35 : vector<8x128xf32>
      %37 = math.exp %36 : vector<8x128xf32>
      %38 = arith.mulf %37, %5 : vector<8x128xf32>
      %39 = arith.subf %32, %34 : vector<1x128xf32>
      %40 = math.exp %39 : vector<1x128xf32>
      %41 = arith.mulf %33, %40 : vector<1x128xf32>
      %cst_20 = arith.constant dense<0.000000e+00> : vector<128xf32>
      %42 = vector.multi_reduction <add>, %38, %cst_20 [0] : vector<8x128xf32> to vector<128xf32>
      %43 = vector.shape_cast %42 : vector<128xf32> to vector<1x128xf32>
      %44 = arith.addf %41, %43 : vector<1x128xf32>
      %c0_21 = arith.constant 0 : index
      %c0_22 = arith.constant 0 : index
      %45 = vector.load %arg10[%c0_21, %c0_22] : memref<1x128xf32, #tpu.memory_space<vmem>>, vector<1x128xf32>
      tpu.vector_store %arg10[%c0_21, %c0_22], %44 {strides = array<i32>} : memref<1x128xf32, #tpu.memory_space<vmem>>, vector<1x128xf32>,
      %c0_23 = arith.constant 0 : index
      %c0_24 = arith.constant 0 : index
      %46 = vector.load %arg9[%c0_23, %c0_24] : memref<1x128xf32, #tpu.memory_space<vmem>>, vector<1x128xf32>
      tpu.vector_store %arg9[%c0_23, %c0_24], %34 {strides = array<i32>} : memref<1x128xf32, #tpu.memory_space<vmem>>, vector<1x128xf32>,
    } else {
    }
    %c1_i32 = arith.constant 1 : i32
    %14 = arith.cmpi eq, %arg0, %c1_i32 : i32
    %c0_i32_5 = arith.constant 0 : i32
    %15 = arith.cmpi eq, %arg1, %c0_i32_5 : i32
    %16 = arith.andi %14, %15 : i1
    %17 = arith.extui %16 : i1 to i32
    %c0_i32_6 = arith.constant 0 : i32
    %18 = arith.cmpi ne, %17, %c0_i32_6 : i32
    scf.if %18 {
      %cst = arith.constant 0.000000e+00 : f32
      %22 = vector.broadcast %cst : f32 to vector<128x128xf32>
      %c0_9 = arith.constant 0 : index
      %c0_10 = arith.constant 0 : index
      %23 = vector.load %arg6[%c0_9, %c0_10] : memref<128x128xf32, #tpu.memory_space<vmem>>, vector<128x128xf32>
      tpu.vector_store %arg6[%c0_9, %c0_10], %22 {strides = array<i32>} : memref<128x128xf32, #tpu.memory_space<vmem>>, vector<128x128xf32>,
    } else {
    }
    %c1_i32_7 = arith.constant 1 : i32
    %19 = arith.cmpi eq, %arg0, %c1_i32_7 : i32
    %20 = arith.extui %19 : i1 to i32
    %c0_i32_8 = arith.constant 0 : i32
    %21 = arith.cmpi ne, %20, %c0_i32_8 : i32
    scf.if %21 {
      %c0_9 = arith.constant 0 : index
      %c0_10 = arith.constant 0 : index
      %22 = vector.load %arg2[%c0_9, %c0_10] : memref<8x128xbf16, #tpu.memory_space<vmem>>, vector<8x128xbf16>
      %c0_11 = arith.constant 0 : index
      %c0_12 = arith.constant 0 : index
      %23 = vector.load %arg4[%c0_11, %c0_12] : memref<128x256xbf16, #tpu.memory_space<vmem>>, vector<128x256xbf16>
      %cst = arith.constant dense<0.000000e+00> : vector<8x256xf32>
      %24 = tpu.matmul %22, %23, %cst {dimension_numbers = #tpu.dot_dimension_numbers<[1], [0], [0], [1], [0, 0, 1, 1], [], []>} : vector<8x128xbf16>, vector<128x256xbf16>, vector<8x256xf32> -> vector<8x256xf32>
      %c0_13 = arith.constant 0 : index
      %c0_14 = arith.constant 0 : index
      %25 = vector.load %arg5[%c0_13, %c0_14] : memref<1x256xf32, #tpu.memory_space<vmem>>, vector<1x256xf32>
      %26 = vector.broadcast %25 : vector<1x256xf32> to vector<8x256xf32>
      %27 = arith.addf %24, %26 : vector<8x256xf32>
      %28 = vector.extract_strided_slice %27 {offsets = [0, 0], sizes = [8, 128], strides = [1, 1]} : vector<8x256xf32> to vector<8x128xf32>
      %29 = vector.extract_strided_slice %27 {offsets = [0, 128], sizes = [8, 128], strides = [1, 1]} : vector<8x256xf32> to vector<8x128xf32>
      %cst_15 = arith.constant -1.000000e+30 : f32
      %30 = vector.broadcast %cst_15 : f32 to vector<8x128xf32>
      %31 = arith.select %3, %29, %30 : vector<8x128xi1>, vector<8x128xf32>
      %c0_16 = arith.constant 0 : index
      %c0_17 = arith.constant 0 : index
      %32 = vector.load %arg10[%c0_16, %c0_17] : memref<1x128xf32, #tpu.memory_space<vmem>>, vector<1x128xf32>
      %cst_18 = arith.constant 1.000000e-16 : f32
      %33 = vector.broadcast %cst_18 : f32 to vector<1x128xf32>
      %34 = arith.addf %32, %33 : vector<1x128xf32>
      %cst_19 = arith.constant 1.000000e+00 : f32
      %35 = vector.broadcast %cst_19 : f32 to vector<1x128xf32>
      %36 = arith.divf %35, %34 : vector<1x128xf32>
      %c0_20 = arith.constant 0 : index
      %c0_21 = arith.constant 0 : index
      %37 = vector.load %arg9[%c0_20, %c0_21] : memref<1x128xf32, #tpu.memory_space<vmem>>, vector<1x128xf32>
      %38 = vector.broadcast %37 : vector<1x128xf32> to vector<8x128xf32>
      %39 = arith.subf %31, %38 : vector<8x128xf32>
      %40 = math.exp %39 : vector<8x128xf32>
      %41 = arith.mulf %40, %5 : vector<8x128xf32>
      %42 = vector.broadcast %36 : vector<1x128xf32> to vector<8x128xf32>
      %43 = arith.mulf %41, %42 : vector<8x128xf32>
      %cst_22 = arith.constant dense<0.000000e+00> : vector<8xf32>
      %44 = vector.multi_reduction <add>, %43, %cst_22 [1] : vector<8x128xf32> to vector<8xf32>
      %45 = vector.shape_cast %44 : vector<8xf32> to vector<8x1xf32>
      %46 = vector.broadcast %45 : vector<8x1xf32> to vector<8x128xf32>
      %47 = arith.mulf %46, %28 : vector<8x128xf32>
      %c0_23 = arith.constant 0 : index
      %c0_24 = arith.constant 0 : index
      %48 = vector.load %arg7[%c0_23, %c0_24] : memref<8x1xf32, #tpu.memory_space<vmem>>, vector<8x1xf32>
      tpu.vector_store %arg7[%c0_23, %c0_24], %45 {strides = array<i32>} : memref<8x1xf32, #tpu.memory_space<vmem>>, vector<8x1xf32>,
      %c0_25 = arith.constant 0 : index
      %c0_26 = arith.constant 0 : index
      %49 = vector.load %arg8[%c0_25, %c0_26] : memref<8x128xf32, #tpu.memory_space<vmem>>, vector<8x128xf32>
      tpu.vector_store %arg8[%c0_25, %c0_26], %47 {strides = array<i32>} : memref<8x128xf32, #tpu.memory_space<vmem>>, vector<8x128xf32>,
      %c0_27 = arith.constant 0 : index
      %c0_28 = arith.constant 0 : index
      %50 = vector.load %arg6[%c0_27, %c0_28] : memref<128x128xf32, #tpu.memory_space<vmem>>, vector<128x128xf32>
      %cst_29 = arith.constant dense<0.000000e+00> : vector<128x128xf32>
      %51 = tpu.matmul %43, %28, %cst_29 {dimension_numbers = #tpu.dot_dimension_numbers<[0], [0], [1], [1], [0, 1, 1, 1], [], []>} : vector<8x128xf32>, vector<8x128xf32>, vector<128x128xf32> -> vector<128x128xf32>
      %52 = arith.addf %50, %51 : vector<128x128xf32>
      %c0_30 = arith.constant 0 : index
      %c0_31 = arith.constant 0 : index
      %53 = vector.load %arg6[%c0_30, %c0_31] : memref<128x128xf32, #tpu.memory_space<vmem>>, vector<128x128xf32>
      tpu.vector_store %arg6[%c0_30, %c0_31], %52 {strides = array<i32>} : memref<128x128xf32, #tpu.memory_space<vmem>>, vector<128x128xf32>,
    } else {
    }
    return
  }
  func.func @transform_0(%arg0: i32, %arg1: i32) -> (i32, i32) {
    %c0_i32 = arith.constant 0 : i32
    %c0_i32_0 = arith.constant 0 : i32
    return %arg1, %c0_i32 : i32, i32
  }
  func.func @transform_1(%arg0: i32, %arg1: i32) -> (i32, i32) {
    %c0_i32 = arith.constant 0 : i32
    %c0_i32_0 = arith.constant 0 : i32
    return %arg1, %c0_i32 : i32, i32
  }
  func.func @transform_2(%arg0: i32, %arg1: i32) -> (i32, i32) {
    %c0_i32 = arith.constant 0 : i32
    %c0_i32_0 = arith.constant 0 : i32
    %c0_i32_1 = arith.constant 0 : i32
    return %c0_i32, %c0_i32_0 : i32, i32
  }
  func.func @transform_3(%arg0: i32, %arg1: i32) -> (i32, i32) {
    %c0_i32 = arith.constant 0 : i32
    %c0_i32_0 = arith.constant 0 : i32
    %c0_i32_1 = arith.constant 0 : i32
    return %c0_i32, %c0_i32_0 : i32, i32
  }
  func.func @transform_4(%arg0: i32, %arg1: i32) -> (i32, i32) {
    %c0_i32 = arith.constant 0 : i32
    %c0_i32_0 = arith.constant 0 : i32
    %c0_i32_1 = arith.constant 0 : i32
    return %c0_i32, %c0_i32_0 : i32, i32
  }
  func.func @transform_5(%arg0: i32, %arg1: i32) -> (i32, i32) {
    %0 = arith.muli %arg0, %arg1 : i32
    %c0_i32 = arith.constant 0 : i32
    %c0_i32_0 = arith.constant 0 : i32
    return %0, %c0_i32 : i32, i32
  }
  func.func @transform_6(%arg0: i32, %arg1: i32) -> (i32, i32) {
    %0 = arith.muli %arg0, %arg1 : i32
    %c0_i32 = arith.constant 0 : i32
    %c0_i32_0 = arith.constant 0 : i32
    return %0, %c0_i32 : i32, i32
  }
}

</mosaic_0001>

<bundles_post_ra>
// kernel: tpu_custom_call.1
= control target key start
LH: loop header
LB: loop body
LE: loop exit
PB: predicated region body
PF: predicated region fallthrough
CT: control target
= control target key end

     0   :  { %12 = vsyncpa [#allocation5], 0  ;;  %s1714_s0 = inlined_call_operand.vmem [shape: bf16[8,128], index: 0, kind: input, shape index: {}]   ;;  %s1715_s1 = inlined_call_operand.vmem [shape: s32[8,1], index: 1, kind: input, shape index: {}]   ;;  %s1716_s2 = inlined_call_operand.hbm [shape: bf16[128,256], index: 2, kind: input, shape index: {}]   ;;  %s1717_s3 = inlined_call_operand.vmem [shape: f32[1,256], index: 3, kind: input, shape index: {}]   ;;  %s1718_s4 = inlined_call_operand.hbm [shape: f32[128,128], index: 4, kind: output, shape index: {0}]   ;;  %s1719_s5 = inlined_call_operand.vmem [shape: f32[8,1], index: 5, kind: output, shape index: {1}]   ;;  %s1720_s6 = inlined_call_operand.hbm [shape: f32[8,128], index: 6, kind: output, shape index: {2}]  }
   0x1   :  { %13 = vsyncpa [#allocation6], 0 }
   0x2   :  { %14 = vsyncpa [#allocation9], 0 }
   0x3   :  { %16 = vsyncpa [#allocation9 + $0x1], 0  ;;  %s1534_s21 = smov 0   ;;  %s1536_s22 = smov 0  }
   0x4   :  { %s1538_s23 = smov 0  }
   0x5 LB: > { %s1123_s24 = sadd.s32 4294967295, %s1482_s23   ;;  %s1124_s25 = sadd.s32 4294967294, %s1482_s23   ;;  %s1482_s23 = sphi %s1538_s23, %s22_s23   ;;  %s1478_s22 = sphi %s1536_s22, %s1731_s22   ;;  %s1474_s21 = sphi %s1534_s21, %s1730_s21  }
   0x6   : > { %s34_s26 = sadd.s32 1, %s1478_s22  ;;  %p1125_p0 = scmp.ge.s32.totalorder %s1482_s23, 1 }
   0x7   : > { %p36_p1 = scmp.ge.s32.totalorder %s34_s26, 2  ;;  %p210_p2 = scmp.lt.s32.totalorder %s1482_s23, 3 }
   0x8   : > { %p1556_p3 = scmp.eq.s32.totalorder %s1123_s24, 0  ;;  %s1484_s29 = smov [#allocation4]  }
   0x9   : > { %s1733_s26 = smov (%p36_p1, %s34_s26), 0  ;;  %p1562_p4 = pnand %p1125_p0, %p210_p2 }
   0xa   : > { %s1724_s27 = scalar_select %p1556_p3, 1, 0 }
   0xb   : > { %s1725_s28 = scalar_select %p1562_p4, 1, 0 }
   0xc   : > { %s236_s30 = sshll.u32 %s1484_s29, 4  ;;  %p1272_p5 = pneg %p1562_p4  ;;  %s237_s30 = int_to_ptr.vmem [resolvable:$true] %s236_s30 }
   0xd   : > { %s1368_s10 = scalar_lea.hbm %s1716_s2, 2048 }
   0xe   : > { %p1570_p6 = pnand %p1556_p3, %p1272_p5  ;;  %p1369_p7 = scmp.ne.s32.totalorder %s1716_s2, %s1368_s10 }
   0xf   : > { %p1375_p11 = scmp.lt.u32.totalorder %s1368_s10, %s1716_s2 }
  0x10   : > { %p1370_p8 = pneg %p1570_p6 }
  0x12   : > { %p1371_p9 = pnand %p1370_p8, %p1369_p7 }
  0x14   : > { %p1372_p10 = pneg %p1371_p9 }
  0x16   : > { %p1377_p12 = pnand %p1375_p11, %p1372_p10 }
  0x18   : > { %1380 = shalt.err (!%p1377_p12)
}
  0x19   : > { %s1381_s15 = scalar_lea.vmem %s237_s30, 2048  ;;  %p1389_p2 = scmp.lt.s32.totalorder %s237_s30, %s237_s30 }
  0x1a   : > { %p1382_p13 = scmp.ne.s32.totalorder %s237_s30, %s1381_s15  ;;  %p1390_p5 = scmp.lt.s32.totalorder %s1381_s15, %s1381_s15 }
  0x1c   : > { %p1384_p0 = pnand %p1382_p13, %p1370_p8  ;;  %p1391_p3 = por %p1390_p5, %p1389_p2 }
  0x1e   : > { %p1385_p1 = pneg %p1384_p0 }
  0x20   : > { %p1392_p4 = pnand %p1391_p3, %p1385_p1 }
  0x22   : > { %1395 = shalt.err (!%p1392_p4)
}
  0x23   : > { %s1485_s16 = smov 128   ;;  %s1486_s17 = smov 8  }
  0x24   : > { %1275 = dma.hbm_to_vmem [thread:$0]  (!%p1570_p6), %s1716_s2, 2048, %s237_s30, [#allocation5], %s1485_s16, %s1485_s16, %s1486_s17  }
  0x25   : > { %p1727_p7 = scmp.ne.s32.totalorder %s1725_s28, 0 }
  0x26   : > { %p1728_p9 = scmp.ne.s32.totalorder (!%p1727_p7), %s1724_s27, 0 }
  0x27   : > { %255 = sbr.rel (%p1727_p7) target bundleno = 1209 (0x4b9), region = 36 }
  0x2e   : > { %1461 = dma.done.wait (%p1728_p9), [#allocation5], 2048  }
  0x2f   : > { %1463 = vsyncadd (%p1728_p9), [#allocation5], 4294965248  ;;  %v1487_v0 = vmov 0   ;;  %v309_v1 = vld [vmem:[%s1715_s1] sm:$0xff]  ;;  %p318_p3 = scmp.eq.s32.totalorder %s1474_s21, 0  ;;  %v310_v2 = vlaneseq  ;;  %v1488_v5 = vmov 0.0  }
  0x30   : > { %1327 = vset.pattern.permute.xlu0 %v1487_v0  ;;  %v1489_v7 = vmov (%p318_p3), -1e+30   ;;  %v1490_v8 = vmov (%p318_p3), 0.0  }
  0x31   : > { %313 = vperm.xlu0 %1327, %v309_v1   ;;  %v1601_v3 = vand.u32 127, %v310_v2  ;;  %324 = vst [vmem:[#allocation2] sm:$0x1] (%p318_p3), %v1489_v7  ;;  %325 = vst [vmem:[#allocation3] sm:$0x1] (%p318_p3), %v1490_v8 }
  0xac   : > { %323 = sbr.rel (!%p318_p3) target bundleno = 179 (0xb3), region = 44 }
  0xb0   : > { %v1603_v4 = vpop.permute.xlu0 %313 }
  0xb1   : > { %vm315_vm0 = vcmp.eq.s32.totalorder %v1603_v4, %v1601_v3 }
  0xb2   : > { %v1610_v6 = vsel %vm315_vm0, 1.0, %v1488_v5 }
  0xb3 PF: > { %p1133_p4 = scmp.ne.s32.totalorder %s1474_s21, 0 }
  0xb4   : > { %v1491_v9 = vmov (!%p1133_p4), 0.0   ;;  %v1328_v10 = vld [vmem:[#allocation4 + $0x4] ss:$8 sps:$4 sm:$0xff] (!%p1133_p4)   ;;  %vm1492_vm1 = vmmov (!%p1133_p4), 0   ;;  %v1329_v11 = vld [vmem:[#allocation4 + $0x14] ss:$8 sps:$4 sm:$0xff] (!%p1133_p4)  }
  0xb5   : > { %328 = sbr.rel (%p1133_p4) target bundleno = 476 (0x1dc), region = 48  ;;  %1214 = vmatprep.subr.bf16.mxu0 (!%p1133_p4), %v1491_v9  ;;  %1230 = vmatprep.mubr.msk.bf16.mxu0 (!%p1133_p4), %vm1492_vm1, %v1491_v9  ;;  %v1330_v12 = vld [vmem:[#allocation4 + $0x24] ss:$8 sps:$4 sm:$0xff] (!%p1133_p4)   ;;  %v1331_v13 = vld [vmem:[#allocation4 + $0x34] ss:$8 sps:$4 sm:$0xff] (!%p1133_p4)   ;;  %v453_v30 = vshrl.u32 (!%p1133_p4), %v310_v2, 7 }
  0xb6   : > { %1215 = vmatpush3.bf16.msra.mxu0 (!%p1133_p4), %v1328_v10  ;;  %v1332_v14 = vld [vmem:[#allocation4 + $0x44] ss:$8 sps:$4 sm:$0xff] (!%p1133_p4)   ;;  %v1333_v15 = vld [vmem:[#allocation4 + $0x54] ss:$8 sps:$4 sm:$0xff] (!%p1133_p4)  }
  0xb7   : > { %1216 = vmatprep.subr.bf16.mxu0 (!%p1133_p4), %v1491_v9  ;;  %v1334_v16 = vld [vmem:[#allocation4 + $0x64] ss:$8 sps:$4 sm:$0xff] (!%p1133_p4)   ;;  %v1335_v17 = vld [vmem:[#allocation4 + $0x74] ss:$8 sps:$4 sm:$0xff] (!%p1133_p4)   ;;  %v454_v34 = vsub.s32 (!%p1133_p4), 0, %v453_v30 }
  0xb8   : > { %v329_v18 = vld [vmem:[%s1714_s0] sm:$0xf] (!%p1133_p4) }
  0xb9   : > { %v1134_v19 = vld [vmem:[%s1717_s3 + $0x1] ss:$0 sm:$0xff] (!%p1133_p4)  ;;  %v448_v32 = vld [vmem:[#allocation2] sm:$0x1] (!%p1133_p4) }
  0xba   : > { %1217 = vmatpush3.bf16.msra.mxu0 (!%p1133_p4), %v1329_v11  ;;  %v449_v48 = vld [vmem:[#allocation3] sm:$0x1] (!%p1133_p4) }
  0xbb   : > { %1218 = vmatprep.subr.bf16.mxu0 (!%p1133_p4), %v1491_v9 }
  0xbe   : > { %1219 = vmatpush3.bf16.msra.mxu0 %v1330_v12 }
  0xbf   : > { %1220 = vmatprep.subr.bf16.mxu0 %v1491_v9 }
  0xc2   : > { %1221 = vmatpush3.bf16.msra.mxu0 %v1331_v13 }
  0xc3   : > { %1222 = vmatprep.subr.bf16.mxu0 %v1491_v9 }
  0xc6   : > { %1223 = vmatpush3.bf16.msra.mxu0 %v1332_v14 }
  0xc7   : > { %1224 = vmatprep.subr.bf16.mxu0 %v1491_v9 }
  0xca   : > { %1225 = vmatpush3.bf16.msra.mxu0 %v1333_v15 }
  0xcb   : > { %1226 = vmatprep.subr.bf16.mxu0 %v1491_v9 }
  0xce   : > { %1227 = vmatpush3.bf16.msra.mxu0 %v1334_v16 }
  0xcf   : > { %1228 = vmatprep.subr.bf16.mxu0 %v1491_v9 }
  0xd2   : > { %1229 = vmatpush3.bf16.msra.mxu0 %v1335_v17 }
  0xd5   : > { %1231 = vmatmul.mubr.bf16.vlgmr.msra.gmra.mrb[0].mxu0 %v329_v18 }
 0x1a8   : > { %v435_v20 = vpop.f32.mrb[0].mxu0 }
 0x1a9   : > { %v436_v21 = vadd.f32 %v1134_v19, %v435_v20  ;;  %v1232_v22 = vpop.f32.mrb[1].mxu0 }
 0x1aa   : > { %v438_v23 = vpop.f32.mrb[2].mxu0 }
 0x1ab   : > { %v441_v24 = vsel %vm315_vm0, %v436_v21, -1e+30  ;;  %v1233_v25 = vpop.f32.mrb[3].mxu0 }
 0x1ac   : > { %v442_v26 = vrot.slane %v441_v24, 4 }
 0x1ae   : > { %v443_v27 = vmax.f32 %v441_v24, %v442_v26 }
 0x1b0   : > { %v444_v28 = vrot.slane %v443_v27, 2 }
 0x1b2   : > { %v445_v29 = vmax.f32 %v443_v27, %v444_v28 }
 0x1b4   : > { %v446_v31 = vrot.slane %v445_v29, 1 }
 0x1b6   : > { %v447_v33 = vmax.f32 %v445_v29, %v446_v31 }
 0x1b8   : > { %v450_v35 = vmax.f32 %v448_v32, %v447_v33 }
 0x1ba   : > { %v455_v36 = vrot.slane %v450_v35, %v454_v34  ;;  %473 = vst [vmem:[#allocation2] sm:$0x1] %v450_v35  ;;  %v461_v39 = vsub.f32 %v448_v32, %v450_v35 }
 0x1bc   : > { %v457_v37 = vsub.f32 %v441_v24, %v455_v36  ;;  %v462_v40 = vmul.f32 1.442695, %v461_v39 }
 0x1be   : > { %v458_v38 = vmul.f32 1.442695, %v457_v37 }
 0x1c0   : > { %1336 = vpow2.f32 %v458_v38 }
 0x1c1   : > { %1338 = vpow2.f32 %v462_v40 }
 0x1ca   : > { %v1337_v41 = vpop.eup %1336 }
 0x1cb   : > { %v460_v42 = vmul.f32 %v1337_v41, %v1610_v6  ;;  %v1339_v47 = vpop.eup %1338 }
 0x1cc   : > { %v464_v50 = vmul.f32 %v1339_v47, %v449_v48 }
 0x1cd   : > { %v465_v43 = vrot.slane %v460_v42, 4 }
 0x1cf   : > { %v466_v44 = vadd.f32 %v465_v43, %v460_v42 }
 0x1d1   : > { %v467_v45 = vrot.slane %v466_v44, 2 }
 0x1d3   : > { %v468_v46 = vadd.f32 %v467_v45, %v466_v44 }
 0x1d5   : > { %v469_v49 = vrot.slane %v468_v46, 1 }
 0x1d7   : > { %v470_v51 = vadd.f32 %v469_v49, %v468_v46 }
 0x1d9   : > { %v471_v52 = vadd.f32 %v470_v51, %v464_v50 }
 0x1db   : > { %472 = vst [vmem:[#allocation3] sm:$0x1] %v471_v52 }
 0x1dc PF: > { %p474_p6 = scmp.eq.s32.totalorder %s1474_s21, 1 }
 0x1dd   : > { %v1493_v53 = vmov (%p474_p6), 0.0  }
 0x1de   : > { %478 = sbr.rel (!%p474_p6) target bundleno = 486 (0x1e6), region = 52  ;;  %479 = vst [vmem:[#allocation7] sm:$0xff] (%p474_p6), %v1493_v53  ;;  %480 = vst [vmem:[#allocation7 + $0x8] sm:$0xff] (%p474_p6), %v1493_v53 }
 0x1df   : > { %481 = vst [vmem:[#allocation7 + $0x10] sm:$0xff] (%p474_p6), %v1493_v53  ;;  %482 = vst [vmem:[#allocation7 + $0x18] sm:$0xff] (%p474_p6), %v1493_v53 }
 0x1e0   : > { %483 = vst [vmem:[#allocation7 + $0x20] sm:$0xff] (%p474_p6), %v1493_v53  ;;  %484 = vst [vmem:[#allocation7 + $0x28] sm:$0xff] (%p474_p6), %v1493_v53 }
 0x1e1   : > { %485 = vst [vmem:[#allocation7 + $0x30] sm:$0xff] (%p474_p6), %v1493_v53  ;;  %486 = vst [vmem:[#allocation7 + $0x38] sm:$0xff] (%p474_p6), %v1493_v53 }
 0x1e2   : > { %487 = vst [vmem:[#allocation7 + $0x40] sm:$0xff] (%p474_p6), %v1493_v53  ;;  %488 = vst [vmem:[#allocation7 + $0x48] sm:$0xff] (%p474_p6), %v1493_v53 }
 0x1e3   : > { %489 = vst [vmem:[#allocation7 + $0x50] sm:$0xff] (%p474_p6), %v1493_v53  ;;  %490 = vst [vmem:[#allocation7 + $0x58] sm:$0xff] (%p474_p6), %v1493_v53 }
 0x1e4   : > { %491 = vst [vmem:[#allocation7 + $0x60] sm:$0xff] (%p474_p6), %v1493_v53  ;;  %492 = vst [vmem:[#allocation7 + $0x68] sm:$0xff] (%p474_p6), %v1493_v53 }
 0x1e5   : > { %493 = vst [vmem:[#allocation7 + $0x70] sm:$0xff] %v1493_v53  ;;  %494 = vst [vmem:[#allocation7 + $0x78] sm:$0xff] %v1493_v53 }
 0x1e6 PF: > { %p1144_p8 = scmp.ne.s32.totalorder %s1474_s21, 1 }
 0x1e7   : > { %v1340_v54 = vld [vmem:[#allocation4 + $0x4] ss:$8 sps:$4 sm:$0xff] (!%p1144_p8)   ;;  %v1342_v55 = vld [vmem:[#allocation4] ss:$8 sps:$4 sm:$0xff] (!%p1144_p8)   ;;  %v1494_v56 = vmov (!%p1144_p8), 0   ;;  %v518_v12 = vshrl.u32 (!%p1144_p8), %v310_v2, 7 }
 0x1e8   : > { %497 = sbr.rel (%p1144_p8) target bundleno = 1160 (0x488), region = 56  ;;  %639 = vmatprep.mubr.bf16.mxu0 (!%p1144_p8), %v1494_v56  ;;  %607 = vmatprep.subr.bf16.mxu0 (!%p1144_p8), %v1340_v54  ;;  %v1343_v57 = vld [vmem:[#allocation4 + $0x14] ss:$8 sps:$4 sm:$0xff] (!%p1144_p8)   ;;  %v1345_v58 = vld [vmem:[#allocation4 + $0x10] ss:$8 sps:$4 sm:$0xff] (!%p1144_p8)   ;;  %vm725_vm2 = vcmask (!%p1144_p8), 64512  }
 0x1e9   : > { %608 = vmatpush1.bf16.msra.mxu0 (!%p1144_p8), %v1342_v55  ;;  %v1346_v59 = vld [vmem:[#allocation4 + $0x24] ss:$8 sps:$4 sm:$0xff] (!%p1144_p8)   ;;  %v1348_v60 = vld [vmem:[#allocation4 + $0x20] ss:$8 sps:$4 sm:$0xff] (!%p1144_p8)   ;;  %v1349_v61 = vld [vmem:[#allocation4 + $0x34] ss:$8 sps:$4 sm:$0xff] (!%p1144_p8)  }
 0x1ea   : > { %609 = vmatprep.subr.bf16.mxu0 (!%p1144_p8), %v1343_v57  ;;  %v1351_v62 = vld [vmem:[#allocation4 + $0x30] ss:$8 sps:$4 sm:$0xff] (!%p1144_p8)   ;;  %v1352_v63 = vld [vmem:[#allocation4 + $0x44] ss:$8 sps:$4 sm:$0xff] (!%p1144_p8)   ;;  %v1354_v0 = vld [vmem:[#allocation4 + $0x40] ss:$8 sps:$4 sm:$0xff] (!%p1144_p8)  }
 0x1eb   : > { %v1355_v1 = vld [vmem:[#allocation4 + $0x54] ss:$8 sps:$4 sm:$0xff] (!%p1144_p8)   ;;  %v1357_v5 = vld [vmem:[#allocation4 + $0x50] ss:$8 sps:$4 sm:$0xff] (!%p1144_p8)   ;;  %v1358_v7 = vld [vmem:[#allocation4 + $0x64] ss:$8 sps:$4 sm:$0xff] (!%p1144_p8)  }
 0x1ec   : > { %v1360_v8 = vld [vmem:[#allocation4 + $0x60] ss:$8 sps:$4 sm:$0xff] (!%p1144_p8)   ;;  %v1361_v9 = vld [vmem:[#allocation4 + $0x74] ss:$8 sps:$4 sm:$0xff] (!%p1144_p8)   ;;  %v1363_v10 = vld [vmem:[#allocation4 + $0x70] ss:$8 sps:$4 sm:$0xff] (!%p1144_p8)  }
 0x1ed   : > { %610 = vmatpush1.bf16.msra.mxu0 (!%p1144_p8), %v1345_v58  ;;  %v498_v11 = vld [vmem:[%s1714_s0] sm:$0xf] (!%p1144_p8)  ;;  %v519_v13 = vsub.s32 (!%p1144_p8), 0, %v518_v12  ;;  %v523_v15 = vsub.s32 (!%p1144_p8), 1, %v518_v12  ;;  %vm674_vm3 = vcmask (!%p1144_p8), 7168   ;;  %v678_v49 = vld [vmem:[#allocation7 + $0x8] sm:$0xff] (!%p1144_p8) }
 0x1ee   : > { %611 = vmatprep.subr.bf16.mxu0 (!%p1144_p8), %v1346_v59  ;;  %v515_v14 = vld [vmem:[%s1717_s3] sm:$0x3] (!%p1144_p8)  ;;  %v677_v50 = vld [vmem:[#allocation7] sm:$0xff] (!%p1144_p8)  ;;  %v679_v56 = vld [vmem:[#allocation7 + $0x10] sm:$0xff] (!%p1144_p8) }
 0x1ef   : > { %v520_v16 = vrot.slane %v515_v14, %v519_v13  ;;  %v524_v17 = vrot.slane %v515_v14, %v523_v15  ;;  %v649_v18 = vld [vmem:[#allocation3] sm:$0x1]  ;;  %v1161_v24 = vld [vmem:[#allocation2] ss:$0 sm:$0xff]  ;;  %v685_v14 = vld [vmem:[#allocation7 + $0x40] sm:$0xff] }
 0x1f0   : > { %v650_v22 = vadd.f32 1e-16, %v649_v18  ;;  %v680_v55 = vld [vmem:[#allocation7 + $0x18] sm:$0xff] }
 0x1f1   : > { %612 = vmatpush1.bf16.msra.mxu0 %v1348_v60 }
 0x1f2   : > { %613 = vmatprep.subr.bf16.mxu0 %v1349_v61  ;;  %1364 = vrcp.f32 %v650_v22  ;;  %v682_v61 = vld [vmem:[#allocation7 + $0x28] sm:$0xff] }
 0x1f5   : > { %614 = vmatpush1.bf16.msra.mxu0 %v1351_v62  ;;  %v681_v62 = vld [vmem:[#allocation7 + $0x20] sm:$0xff] }
 0x1f6   : > { %615 = vmatprep.subr.bf16.mxu0 %v1352_v63 }
 0x1f9   : > { %616 = vmatpush1.bf16.msra.mxu0 %v1354_v0 }
 0x1fa   : > { %617 = vmatprep.subr.bf16.mxu0 %v1355_v1 }
 0x1fc   : > { %v1365_v29 = vpop.eup %1364 }
 0x1fd   : > { %618 = vmatpush1.bf16.msra.mxu0 %v1357_v5  ;;  %v668_v30 = vrot.slane %v1365_v29, %v519_v13  ;;  %v686_v13 = vld [vmem:[#allocation7 + $0x48] sm:$0xff] }
 0x1fe   : > { %619 = vmatprep.subr.bf16.mxu0 %v1358_v7  ;;  %v684_v7 = vld [vmem:[#allocation7 + $0x38] sm:$0xff] }
 0x201   : > { %620 = vmatpush1.bf16.msra.mxu0 %v1360_v8  ;;  %v683_v8 = vld [vmem:[#allocation7 + $0x30] sm:$0xff] }
 0x202   : > { %621 = vmatprep.subr.bf16.mxu0 %v1361_v9 }
 0x205   : > { %622 = vmatpush1.bf16.msra.mxu0 %v1363_v10 }
 0x208   : > { %640 = vmatmul.mubr.bf16.vlgmr.msra.gmra.mrb[0].mxu0 %v498_v11 }
 0x2db   : > { %v641_v19 = vpop.f32.mrb[0].mxu0 }
 0x2dc   : > { %v642_v20 = vadd.f32 %v641_v19, %v520_v16  ;;  %v643_v21 = vpop.f32.mrb[1].mxu0  ;;  %v688_v19 = vld [vmem:[#allocation7 + $0x58] sm:$0xff] }
 0x2dd   : > { %v644_v23 = vadd.f32 %v643_v21, %v524_v17  ;;  %v645_v25 = vpop.f32.mrb[2].mxu0 }
 0x2de   : > { %v646_v26 = vpop.f32.mrb[3].mxu0  ;;  %1234 = vmatprep.subr.mxu1 %v642_v20  ;;  %v690_v25 = vld [vmem:[#allocation7 + $0x68] sm:$0xff] }
 0x2df   : > { %v648_v2 = vsel %vm315_vm0, %v644_v23, -1e+30  ;;  %1235 = vmatpush3.msra.mxu1 %v642_v20  ;;  %v689_v26 = vld [vmem:[#allocation7 + $0x60] sm:$0xff] }
 0x2e0   : > { %v660_v27 = vsub.f32 %v648_v2, %v1161_v24 }
 0x2e2   : > { %v661_v28 = vmul.f32 1.442695, %v660_v27 }
 0x2e4   : > { %1366 = vpow2.f32 %v661_v28 }
 0x2ee   : > { %v1367_v31 = vpop.eup %1366 }
 0x2ef   : > { %v663_v32 = vmul.f32 %v1367_v31, %v1610_v6  ;;  %v691_v31 = vld [vmem:[#allocation7 + $0x70] sm:$0xff] }
 0x2f1   : > { %v670_v33 = vmul.f32 %v668_v30, %v663_v32  ;;  %v692_v30 = vld [vmem:[#allocation7 + $0x78] sm:$0xff] }
 0x2f3   : > { %693 = vxpose.xlu0.b32.start.end [1/1] (short) %v670_v33, 128 }
 0x35c   : > { %671 = vadd.xlane.f32.xlu0 %v670_v33 }
 0x373   : > { %v709_v34 = vpop.trf.xlu0 }
 0x374   : > { %1236 = vmatprep.mubr.msk.f32.mxu1 %vm725_vm2, %v709_v34 }
 0x377   : > { %v710_v35 = vpop.trf.xlu0 }
 0x378   : > { %1237 = vmatmul.mubr.msk.f32.vlgmr.msra.gmra.mrb[0].mxu1 %vm725_vm2, %v710_v35 }
 0x37b   : > { %v711_v3 = vpop.trf.xlu0 }
 0x37c   : > { %1239 = vmatprep.mubr.msk.f32.mxu1 %vm725_vm2, %v711_v3 }
 0x37f   : > { %v712_v4 = vpop.trf.xlu0 }
 0x380   : > { %1240 = vmatmul.mubr.msk.f32.gmra.mrb[2].mxu1 %vm725_vm2, %v712_v4 }
 0x383   : > { %v713_v36 = vpop.trf.xlu0 }
 0x384   : > { %1242 = vmatprep.mubr.msk.f32.mxu1 %vm725_vm2, %v713_v36 }
 0x387   : > { %v714_v6 = vpop.trf.xlu0 }
 0x388   : > { %1243 = vmatmul.mubr.msk.f32.gmra.mrb[4].mxu1 %vm725_vm2, %v714_v6 }
 0x38b   : > { %v715_v37 = vpop.trf.xlu0 }
 0x38c   : > { %1245 = vmatprep.mubr.msk.f32.mxu1 %vm725_vm2, %v715_v37 }
 0x38f   : > { %v716_v38 = vpop.trf.xlu0 }
 0x390   : > { %1246 = vmatmul.mubr.msk.f32.gmra.mrb[6].mxu1 %vm725_vm2, %v716_v38 }
 0x393   : > { %v717_v39 = vpop.trf.xlu0 }
 0x394   : > { %1248 = vmatprep.mubr.msk.f32.mxu1 %vm725_vm2, %v717_v39 }
 0x397   : > { %v718_v40 = vpop.trf.xlu0 }
 0x398   : > { %1249 = vmatmul.mubr.msk.f32.gmra.mrb[8].mxu1 %vm725_vm2, %v718_v40 }
 0x39b   : > { %v719_v41 = vpop.trf.xlu0 }
 0x39c   : > { %1251 = vmatprep.mubr.msk.f32.mxu1 %vm725_vm2, %v719_v41 }
 0x39f   : > { %v720_v42 = vpop.trf.xlu0 }
 0x3a0   : > { %1252 = vmatmul.mubr.msk.f32.gmra.mrb[10].mxu1 %vm725_vm2, %v720_v42 }
 0x3a3   : > { %v721_v43 = vpop.trf.xlu0 }
 0x3a4   : > { %1254 = vmatprep.mubr.msk.f32.mxu1 %vm725_vm2, %v721_v43 }
 0x3a7   : > { %v722_v44 = vpop.trf.xlu0 }
 0x3a8   : > { %1255 = vmatmul.mubr.msk.f32.gmra.mrb[12].mxu1 %vm725_vm2, %v722_v44 }
 0x3ab   : > { %v723_v45 = vpop.trf.xlu0 }
 0x3ac   : > { %1257 = vmatprep.mubr.msk.f32.mxu1 %vm725_vm2, %v723_v45 }
 0x3af   : > { %v724_v46 = vpop.trf.xlu0 }
 0x3b0   : > { %1258 = vmatmul.mubr.msk.f32.gmra.mrb[14].mxu1 %vm725_vm2, %v724_v46 }
 0x3e9   : > { %v672_v47 = vpop.xlane.xlu0 %671 }
 0x3ea   : > { %v673_v48 = vmul.f32 %v672_v47, %v642_v20  ;;  %675 = vst.msk [vmem:[%s1719_s5] sm:$0xff] %vm674_vm3, %v672_v47  ;;  %v687_v20 = vld [vmem:[#allocation7 + $0x50] sm:$0xff] }
 0x3ec   : > { %676 = vst [vmem:[#allocation8] sm:$0xff] %v673_v48 }
 0x44b   : > { %v1238_v51 = vpop.f32.mrb[0].mxu1 }
 0x44c   : > { %v920_v52 = vadd.f32 %v1238_v51, %v678_v49  ;;  %v840_v53 = vpop.f32.mrb[1].mxu1 }
 0x44d   : > { %v919_v54 = vadd.f32 %v840_v53, %v677_v50 }
 0x44e   : > { %936 = vst [vmem:[#allocation7 + $0x8] sm:$0xff] %v920_v52 }
 0x44f   : > { %935 = vst [vmem:[#allocation7] sm:$0xff] %v919_v54 }
 0x453   : > { %v1241_v57 = vpop.f32.mrb[2].mxu1 }
 0x454   : > { %v922_v58 = vadd.f32 %v1241_v57, %v680_v55  ;;  %v850_v59 = vpop.f32.mrb[3].mxu1 }
 0x455   : > { %v921_v60 = vadd.f32 %v850_v59, %v679_v56 }
 0x456   : > { %938 = vst [vmem:[#allocation7 + $0x18] sm:$0xff] %v922_v58 }
 0x457   : > { %937 = vst [vmem:[#allocation7 + $0x10] sm:$0xff] %v921_v60 }
 0x45b   : > { %v1244_v63 = vpop.f32.mrb[4].mxu1 }
 0x45c   : > { %v924_v0 = vadd.f32 %v1244_v63, %v682_v61  ;;  %v860_v1 = vpop.f32.mrb[5].mxu1 }
 0x45d   : > { %v923_v5 = vadd.f32 %v860_v1, %v681_v62 }
 0x45e   : > { %940 = vst [vmem:[#allocation7 + $0x28] sm:$0xff] %v924_v0 }
 0x45f   : > { %939 = vst [vmem:[#allocation7 + $0x20] sm:$0xff] %v923_v5 }
 0x463   : > { %v1247_v9 = vpop.f32.mrb[6].mxu1 }
 0x464   : > { %v926_v10 = vadd.f32 %v1247_v9, %v684_v7  ;;  %v870_v11 = vpop.f32.mrb[7].mxu1 }
 0x465   : > { %v925_v12 = vadd.f32 %v870_v11, %v683_v8 }
 0x466   : > { %942 = vst [vmem:[#allocation7 + $0x38] sm:$0xff] %v926_v10 }
 0x467   : > { %941 = vst [vmem:[#allocation7 + $0x30] sm:$0xff] %v925_v12 }
 0x46b   : > { %v1250_v15 = vpop.f32.mrb[8].mxu1 }
 0x46c   : > { %v928_v16 = vadd.f32 %v1250_v15, %v686_v13  ;;  %v880_v17 = vpop.f32.mrb[9].mxu1 }
 0x46d   : > { %v927_v18 = vadd.f32 %v880_v17, %v685_v14 }
 0x46e   : > { %944 = vst [vmem:[#allocation7 + $0x48] sm:$0xff] %v928_v16 }
 0x46f   : > { %943 = vst [vmem:[#allocation7 + $0x40] sm:$0xff] %v927_v18 }
 0x473   : > { %v1253_v21 = vpop.f32.mrb[10].mxu1 }
 0x474   : > { %v930_v22 = vadd.f32 %v1253_v21, %v688_v19  ;;  %v890_v23 = vpop.f32.mrb[11].mxu1 }
 0x475   : > { %v929_v24 = vadd.f32 %v890_v23, %v687_v20 }
 0x476   : > { %946 = vst [vmem:[#allocation7 + $0x58] sm:$0xff] %v930_v22 }
 0x477   : > { %945 = vst [vmem:[#allocation7 + $0x50] sm:$0xff] %v929_v24 }
 0x47b   : > { %v1256_v2 = vpop.f32.mrb[12].mxu1 }
 0x47c   : > { %v932_v27 = vadd.f32 %v1256_v2, %v690_v25  ;;  %v900_v28 = vpop.f32.mrb[13].mxu1 }
 0x47d   : > { %v931_v29 = vadd.f32 %v900_v28, %v689_v26 }
 0x47e   : > { %948 = vst [vmem:[#allocation7 + $0x68] sm:$0xff] %v932_v27 }
 0x47f   : > { %947 = vst [vmem:[#allocation7 + $0x60] sm:$0xff] %v931_v29 }
 0x483   : > { %v1259_v32 = vpop.f32.mrb[14].mxu1 }
 0x484   : > { %v934_v33 = vadd.f32 %v1259_v32, %v692_v30  ;;  %v910_v34 = vpop.f32.mrb[15].mxu1 }
 0x485   : > { %v933_v35 = vadd.f32 %v910_v34, %v691_v31 }
 0x486   : > { %950 = vst [vmem:[#allocation7 + $0x78] sm:$0xff] %v934_v33 }
 0x487   : > { %949 = vst [vmem:[#allocation7 + $0x70] sm:$0xff] %v933_v35 }
 0x488 PF: > { %p1658_p10 = scmp.eq.s32.totalorder %s1123_s24, 1  ;;  %s1495_s14 = smov [#allocation7]  }
 0x489   : > { %s967_s15 = sshll.u32 %s1495_s14, 4  ;;  %s968_s15 = int_to_ptr.vmem [resolvable:$true] %s967_s15 }
 0x48a   : > { %s1396_s16 = scalar_lea.vmem %s968_s15, 2048  ;;  %p1403_p0 = scmp.lt.s32.totalorder %s968_s15, %s968_s15 }
 0x48b   : > { %p1397_p11 = scmp.ne.s32.totalorder %s968_s15, %s1396_s16  ;;  %p1404_p1 = scmp.lt.s32.totalorder %s1396_s16, %s1396_s16 }
 0x48d   : > { %p1398_p12 = pnand %p1397_p11, %p1658_p10  ;;  %p1405_p2 = por %p1404_p1, %p1403_p0 }
 0x48f   : > { %p1399_p13 = pneg %p1398_p12 }
 0x491   : > { %p1406_p5 = pnand %p1405_p2, %p1399_p13 }
 0x493   : > { %1409 = shalt.err (!%p1406_p5)
}
 0x494   : > { %s1410_s24 = scalar_lea.hbm %s1718_s4, 2048 }
 0x495   : > { %p1411_p7 = scmp.ne.s32.totalorder %s1718_s4, %s1410_s24  ;;  %p1416_p4 = scmp.lt.u32.totalorder %s1410_s24, %s1718_s4 }
 0x497   : > { %p1412_p9 = pnand %p1411_p7, %p1658_p10 }
 0x499   : > { %p1413_p3 = pneg %p1412_p9 }
 0x49b   : > { %p1418_p6 = pnand %p1416_p4, %p1413_p3 }
 0x49d   : > { %1421 = shalt.err (!%p1418_p6)
}
 0x49e   : > { %s1496_s28 = smov 128   ;;  %s1497_s30 = smov 8  }
 0x49f   : > { %1265 = dma.vmem_to_hbm [thread:$0]  (%p1658_p10), %s968_s15, 2048, %s1718_s4, [#allocation6], %s1496_s28, %s1496_s28, %s1497_s30  }
 0x4a0   : > { %s1498_s8 = smov [#allocation8]  }
 0x4a1   : > { %s988_s9 = sshll.u32 %s1498_s8, 4  ;;  %s989_s9 = int_to_ptr.vmem [resolvable:$true] %s988_s9 }
 0x4a2   : > { %s1422_s10 = scalar_lea.vmem %s989_s9, 128  ;;  %s1428_s11 = scalar_lea.vmem %s989_s9, 256 }
 0x4a3   : > { %p1423_p8 = scmp.ne.s32.totalorder %s989_s9, %s1422_s10  ;;  %p1429_p13 = scmp.lt.s32.totalorder %s989_s9, %s989_s9 }
 0x4a4   : > { %p1430_p0 = scmp.lt.s32.totalorder %s1428_s11, %s1422_s10 }
 0x4a5   : > { %p1424_p11 = pnand %p1423_p8, %p1658_p10 }
 0x4a6   : > { %p1431_p1 = por %p1430_p0, %p1429_p13 }
 0x4a7   : > { %p1425_p12 = pneg %p1424_p11 }
 0x4a9   : > { %p1432_p2 = pnand %p1431_p1, %p1425_p12 }
 0x4ab   : > { %1435 = shalt.err (!%p1432_p2)
}
 0x4ac   : > { %s1436_s16 = scalar_lea.hbm %s1720_s6, 128 }
 0x4ad   : > { %p1437_p5 = scmp.ne.s32.totalorder %s1720_s6, %s1436_s16  ;;  %p1442_p3 = scmp.lt.u32.totalorder %s1436_s16, %s1720_s6 }
 0x4af   : > { %p1438_p7 = pnand %p1437_p5, %p1658_p10 }
 0x4b1   : > { %p1439_p9 = pneg %p1438_p7 }
 0x4b3   : > { %p1444_p4 = pnand %p1442_p3, %p1439_p9 }
 0x4b5   : > { %1447 = shalt.err (!%p1444_p4)
}
 0x4b6   : > { %1267 = dma.vmem_to_hbm [thread:$0]  (%p1658_p10), %s989_s9, 128, %s1720_s6, [#allocation9]  }
 0x4b7   : > { %1465 = dma.done.wait (%p1658_p10), [#allocation6], 2048  }
 0x4b8   : > { %1467 = vsyncadd (%p1658_p10), [#allocation6], 4294965248 }
 0x4b9 PF: > { %p1285_p6 = scmp.ge.s32.totalorder %s1482_s23, 2  ;;  %p1286_p8 = scmp.eq.s32.totalorder %s1124_s25, 1 }
 0x4bb   : > { %p1277_p11 = pnand %p1286_p8, %p1285_p6 }
 0x4bd   : > { %1469 = dma.done.wait (!%p1277_p11), [#allocation9], 128  }
 0x4be   : > { %1471 = vsyncadd (!%p1277_p11), [#allocation9], 4294967168  ;;  %s22_s23 = sadd.s32 1, %s1482_s23   ;;  %s1730_s21 = smov %s1478_s22 }
 0x4bf   : > { %p19_p12 = scmp.ge.s32.totalorder %s22_s23, 4   ;;  %s1731_s22 = smov %s1733_s26 }
 0x4c1   :  { %21 = sbr.rel (!%p19_p12) target bundleno = 5 (0x5), region = 116 }
 0x4c8   :  { %1018 = vsyncpa [#allocation5], 1 }
 0x4c9   :  { %1020 = vsyncpa [#allocation5 + $0x1], 1 }
 0x4ca   :  { %1021 = vsyncpa [#allocation6], 1 }
 0x4cb   :  { %1023 = vsyncpa [#allocation6 + $0x1], 1 }
 0x4cc   :  { %1024 = vsyncpa [#allocation9], 1 }
 0x4cd   :  { %1026 = vsyncpa [#allocation9 + $0x1], 1 }

</bundles_post_ra>
